<compile_context>
chip_gen: v7x
topology: tpu7x:2x2x1
jax: 0.10.0
libtpu: 0.0.40
codegen_flags: <defaults>
</compile_context>

<pallas_src>
import functools
import math

import jax
import jax.numpy as jnp
from jax.experimental import pallas as pl
from jax.experimental.pallas import tpu as pltpu


def _round_up(x, m):
    return (x + m - 1) // m * m


def _fgl_kernel(num_heads, hidden_dim, seq_len,
                x_ref,       # (R_tile, F)  bf16
                wpre_ref,    # (F, 3H)      bf16  gather + proj + in_proj fused, Q-scaled
                wpost_ref,   # (H, G)       f32   out_proj + output_projection fused
                bias_ref,    # (2, BL)      f32   row0 = b_pre (3H), row1 = b_post (G)
                out_ref):    # (R_tile, G)  f32
    H = hidden_dim
    hd = H // num_heads
    R = x_ref.shape[0]
    TB = R // seq_len
    G = out_ref.shape[-1]

    b_pre = bias_ref[0:1, :3 * H]                                     # (1, 3H)
    b_post = bias_ref[1:2, :G]                                        # (1, G)

    # Fused gather + Linear(G->H) + in_proj(H->3H): one MXU matmul, f32 acc.
    qkv = jnp.dot(x_ref[...], wpre_ref[...],
                  preferred_element_type=jnp.float32) + b_pre         # (R, 3H) f32
    qkv3 = qkv.reshape(TB, seq_len, 3 * H)                            # leading-dim split

    # Per-head scores, batched over the batch-tile dim (single-batch einsum).
    scores, vs = [], []
    for h in range(num_heads):
        lo = h * hd
        q_h = qkv3[:, :, lo:lo + hd]                                  # (TB, S, hd)
        k_h = qkv3[:, :, H + lo:H + lo + hd]
        vs.append(qkv3[:, :, 2 * H + lo:2 * H + lo + hd])
        scores.append(jnp.einsum('bqd,bkd->bqk', q_h, k_h,
                                 preferred_element_type=jnp.float32))  # (TB, S, S)

    # One softmax pass over all heads (leading-axis stack -> full vregs,
    # single max/exp/sum/reciprocal instead of 8 tiny ones).
    s_all = jnp.stack(scores, axis=0)                                 # (nh, TB, S, S)
    s_all = s_all - jnp.max(s_all, axis=-1, keepdims=True)
    p_all = jnp.exp(s_all)
    p_all = p_all * pl.reciprocal(jnp.sum(p_all, axis=-1, keepdims=True),
                                  approx=True)
    # For large S, this block would switch to a key-tiled online-softmax
    # accumulator so the (nh, TB, S, S) score tensor is never materialized.

    ctx = [jnp.einsum('bqk,bkd->bqd', p_all[h], vs[h],
                      preferred_element_type=jnp.float32)
           for h in range(num_heads)]                                 # nh x (TB, S, hd)
    attn = jnp.concatenate(ctx, axis=-1).reshape(R, H)                # (R, H) f32

    # Fused attention out_proj + Linear(H->G): one matmul, all f32 (no casts).
    out = jnp.dot(attn, wpost_ref[...],
                  preferred_element_type=jnp.float32) + b_post
    out_ref[...] = out.astype(out_ref.dtype)


def feature_group_layer(x, group_features, params, *, num_heads=8, batch_tile=None):
    """x: (B, S, F) float32.  Returns (B, S, G) with G = len(group_features)."""
    B, S, F = x.shape
    G = len(group_features)
    H = params["proj_w"].shape[0]             # nn.Linear weight is (out, in)
    assert H % num_heads == 0
    hd = H // num_heads
    scale = 1.0 / math.sqrt(hd)

    # ---- host-side algebraic fusion (all in f32, bf16 cast only at the end) ----
    idx = jnp.asarray(group_features, jnp.int32)
    # Feature gather folded into the first weight: (F, H) selection/projection.
    wp_sel = jnp.zeros((F, H), jnp.float32).at[idx].add(
        params["proj_w"].astype(jnp.float32).T)                       # (F, H)

    wqkv = params["in_proj_w"].astype(jnp.float32).T                  # (H, 3H)
    wqkv = wqkv.at[:, :H].multiply(scale)          # fold 1/sqrt(head_dim) into Q
    bqkv = params["in_proj_b"].astype(jnp.float32).at[:H].multiply(scale)

    w_pre = (wp_sel @ wqkv).astype(jnp.bfloat16)                      # (F, 3H) bf16
    b_pre = params["proj_b"].astype(jnp.float32) @ wqkv + bqkv        # (3H,)   f32

    wo_t = params["attn_out_w"].astype(jnp.float32).T                 # (H, H)
    wout_t = params["out_w"].astype(jnp.float32).T                    # (H, G)
    w_post = wo_t @ wout_t                                            # (H, G)  f32
    b_post = params["attn_out_b"].astype(jnp.float32) @ wout_t \
        + params["out_b"].astype(jnp.float32)                         # (G,)

    BL = _round_up(max(3 * H, G), 128)
    bias_pack = jnp.zeros((2, BL), jnp.float32)
    bias_pack = bias_pack.at[0, :3 * H].set(b_pre)
    bias_pack = bias_pack.at[1, :G].set(b_post)

    x_flat = x.reshape(B * S, F).astype(jnp.bfloat16)                 # (B*S, F)

    # ---- row tiling: whole sequences per tile, multi-step grid by default ----
    if batch_tile is None:
        # >=2 grid steps overlap prefetch/writeback with compute and let v7x's
        # two TensorCores split the 'parallel' axis; keep tiles <=1024 rows.
        cands = [d for d in range(1, B + 1)
                 if B % d == 0 and (d * S) % 8 == 0
                 and d * S <= 1024 and (B // d) >= 2]
        batch_tile = max(cands) if cands else B
    TB = batch_tile
    assert B % TB == 0
    R_tile = TB * S
    assert R_tile % 8 == 0 or TB == B, (
        "batch_tile*seq_len must be a multiple of 8 (sublane constraint)")

    kernel = functools.partial(_fgl_kernel, num_heads, H, S)

    def const_spec(arr):
        return pl.BlockSpec(arr.shape, lambda b: (0,) * arr.ndim)

    out_flat = pl.pallas_call(
        kernel,
        out_shape=jax.ShapeDtypeStruct((B * S, G), jnp.float32),
        grid_spec=pltpu.PrefetchScalarGridSpec(
            num_scalar_prefetch=0,
            grid=(B // TB,),
            in_specs=[
                pl.BlockSpec((R_tile, F), lambda b: (b, 0)),
                const_spec(w_pre), const_spec(w_post), const_spec(bias_pack),
            ],
            out_specs=pl.BlockSpec((R_tile, G), lambda b: (b, 0)),
        ),
        compiler_params=pltpu.CompilerParams(
            dimension_semantics=("parallel",)),
    )(x_flat, w_pre, w_post, bias_pack)

    return out_flat.reshape(B, S, G).astype(x.dtype)


def init_params(key, num_group_features, hidden_dim):
    """Deterministic synthetic parameters matching the module's shapes."""
    ks = jax.random.split(key, 8)
    G, H = num_group_features, hidden_dim
    s = 0.05
    return {
        "proj_w":     jax.random.normal(ks[0], (H, G), jnp.float32) * s,
        "proj_b":     jax.random.normal(ks[1], (H,), jnp.float32) * s,
        "in_proj_w":  jax.random.normal(ks[2], (3 * H, H), jnp.float32) * s,
        "in_proj_b":  jax.random.normal(ks[3], (3 * H,), jnp.float32) * s,
        "attn_out_w": jax.random.normal(ks[4], (H, H), jnp.float32) * s,
        "attn_out_b": jax.random.normal(ks[5], (H,), jnp.float32) * s,
        "out_w":      jax.random.normal(ks[6], (G, H), jnp.float32) * s,
        "out_b":      jax.random.normal(ks[7], (G,), jnp.float32) * s,
    }


def _reference(x, group_features, params, num_heads):
    """Pure-JAX f32 reference matching PyTorch FeatureGroupLayer.forward."""
    idx = jnp.asarray(group_features, dtype=jnp.int32)
    xg = jnp.take(x, idx, axis=2)
    H = params["proj_w"].shape[0]
    hd = H // num_heads
    proj = xg @ params["proj_w"].T + params["proj_b"]
    q = proj @ params["in_proj_w"][:H].T + params["in_proj_b"][:H]
    k = proj @ params["in_proj_w"][H:2 * H].T + params["in_proj_b"][H:2 * H]
    v = proj @ params["in_proj_w"][2 * H:].T + params["in_proj_b"][2 * H:]
    B, S, _ = proj.shape

    def split(t):
        return t.reshape(B, S, num_heads, hd).transpose(0, 2, 1, 3)

    qh, kh, vh = split(q), split(k), split(v)
    s = jnp.einsum('bnqd,bnkd->bnqk', qh, kh) / math.sqrt(hd)
    p = jax.nn.softmax(s, axis=-1)
    ctx = jnp.einsum('bnqk,bnkd->bnqd', p, vh).transpose(0, 2, 1, 3).reshape(B, S, H)
    attn = ctx @ params["attn_out_w"].T + params["attn_out_b"]
    return attn @ params["out_w"].T + params["out_b"]


if __name__ == "__main__":
    B, S, F = 2, 8, 16
    hidden_dim, num_heads = 32, 8             # head_dim = 4
    group_features = [1, 3, 6, 10, 12, 15]    # G = 6

    key = jax.random.PRNGKey(0)
    kx, kp = jax.random.split(key)
    x = jax.random.normal(kx, (B, S, F), jnp.float32)
    params = init_params(kp, len(group_features), hidden_dim)

    out = feature_group_layer(x, group_features, params, num_heads=num_heads)
    out = jax.block_until_ready(out)
    assert out.shape == (B, S, len(group_features)), out.shape

    ref = _reference(x, group_features, params, num_heads)
    err = float(jnp.max(jnp.abs(out - ref)))
    assert err < 2e-2, f"max abs error vs reference: {err}"

    print("KERNEL_OK")
</pallas_src>

<mosaic_0001>
module attributes {stable_mosaic.version = 11 : i64} {
  func.func @_fgl_kernel(%arg0: i32, %arg1: memref<8x16xbf16, #tpu.memory_space<vmem>>, %arg2: memref<16x96xbf16, #tpu.memory_space<vmem>>, %arg3: memref<32x6xf32, #tpu.memory_space<vmem>>, %arg4: memref<2x128xf32, #tpu.memory_space<vmem>>, %arg5: memref<8x6xf32, #tpu.memory_space<vmem>>) attributes {dimension_semantics = [#tpu.dimension_semantics<parallel>], iteration_bounds = array<i64: 2>, scalar_prefetch = 0 : i64, scratch_operands = 0 : i64, tpu.core_type = #tpu.core_type<tc>, window_params = [{transform_indices = @transform_0, window_bounds = array<i64: 8, 16>}, {pipeline_mode = #tpu.pipeline_mode<synchronous>, transform_indices = @transform_1, window_bounds = array<i64: 16, 96>}, {pipeline_mode = #tpu.pipeline_mode<synchronous>, transform_indices = @transform_2, window_bounds = array<i64: 32, 6>}, {pipeline_mode = #tpu.pipeline_mode<synchronous>, transform_indices = @transform_3, window_bounds = array<i64: 2, 128>}, {transform_indices = @transform_4, window_bounds = array<i64: 8, 6>}]} {
    %c0 = arith.constant 0 : index
    %c0_0 = arith.constant 0 : index
    %0 = vector.load %arg4[%c0, %c0_0] : memref<2x128xf32, #tpu.memory_space<vmem>>, vector<1x96xf32>
    %c1 = arith.constant 1 : index
    %c0_1 = arith.constant 0 : index
    %1 = vector.load %arg4[%c1, %c0_1] : memref<2x128xf32, #tpu.memory_space<vmem>>, vector<1x6xf32>
    %c0_2 = arith.constant 0 : index
    %c0_3 = arith.constant 0 : index
    %2 = vector.load %arg1[%c0_2, %c0_3] : memref<8x16xbf16, #tpu.memory_space<vmem>>, vector<8x16xbf16>
    %c0_4 = arith.constant 0 : index
    %c0_5 = arith.constant 0 : index
    %3 = vector.load %arg2[%c0_4, %c0_5] : memref<16x96xbf16, #tpu.memory_space<vmem>>, vector<16x96xbf16>
    %cst = arith.constant dense<0.000000e+00> : vector<8x96xf32>
    %4 = tpu.matmul %2, %3, %cst {dimension_numbers = #tpu.dot_dimension_numbers<[1], [0], [0], [1], [0, 0, 1, 1], [], []>} : vector<8x16xbf16>, vector<16x96xbf16>, vector<8x96xf32> -> vector<8x96xf32>
    %5 = vector.broadcast %0 : vector<1x96xf32> to vector<8x96xf32>
    %6 = arith.addf %4, %5 : vector<8x96xf32>
    %7 = vector.shape_cast %6 : vector<8x96xf32> to vector<1x8x96xf32>
    %8 = vector.extract_strided_slice %7 {offsets = [0, 0, 0], sizes = [1, 8, 4], strides = [1, 1, 1]} : vector<1x8x96xf32> to vector<1x8x4xf32>
    %9 = vector.extract_strided_slice %7 {offsets = [0, 0, 32], sizes = [1, 8, 4], strides = [1, 1, 1]} : vector<1x8x96xf32> to vector<1x8x4xf32>
    %10 = vector.extract_strided_slice %7 {offsets = [0, 0, 64], sizes = [1, 8, 4], strides = [1, 1, 1]} : vector<1x8x96xf32> to vector<1x8x4xf32>
    "tpu.trace_start"() <{level = 10 : i32, message = "bqd,bkd->bqk"}> : () -> ()
    %cst_6 = arith.constant dense<0.000000e+00> : vector<1x8x8xf32>
    %11 = tpu.matmul %8, %9, %cst_6 {dimension_numbers = #tpu.dot_dimension_numbers<[2], [2], [1], [1], [0, 0, 0, 1, 1, 1], [0], [0]>} : vector<1x8x4xf32>, vector<1x8x4xf32>, vector<1x8x8xf32> -> vector<1x8x8xf32>
    "tpu.trace_stop"() : () -> ()
    %12 = vector.extract_strided_slice %7 {offsets = [0, 0, 4], sizes = [1, 8, 4], strides = [1, 1, 1]} : vector<1x8x96xf32> to vector<1x8x4xf32>
    %13 = vector.extract_strided_slice %7 {offsets = [0, 0, 36], sizes = [1, 8, 4], strides = [1, 1, 1]} : vector<1x8x96xf32> to vector<1x8x4xf32>
    %14 = vector.extract_strided_slice %7 {offsets = [0, 0, 68], sizes = [1, 8, 4], strides = [1, 1, 1]} : vector<1x8x96xf32> to vector<1x8x4xf32>
    "tpu.trace_start"() <{level = 10 : i32, message = "bqd,bkd->bqk"}> : () -> ()
    %cst_7 = arith.constant dense<0.000000e+00> : vector<1x8x8xf32>
    %15 = tpu.matmul %12, %13, %cst_7 {dimension_numbers = #tpu.dot_dimension_numbers<[2], [2], [1], [1], [0, 0, 0, 1, 1, 1], [0], [0]>} : vector<1x8x4xf32>, vector<1x8x4xf32>, vector<1x8x8xf32> -> vector<1x8x8xf32>
    "tpu.trace_stop"() : () -> ()
    %16 = vector.extract_strided_slice %7 {offsets = [0, 0, 8], sizes = [1, 8, 4], strides = [1, 1, 1]} : vector<1x8x96xf32> to vector<1x8x4xf32>
    %17 = vector.extract_strided_slice %7 {offsets = [0, 0, 40], sizes = [1, 8, 4], strides = [1, 1, 1]} : vector<1x8x96xf32> to vector<1x8x4xf32>
    %18 = vector.extract_strided_slice %7 {offsets = [0, 0, 72], sizes = [1, 8, 4], strides = [1, 1, 1]} : vector<1x8x96xf32> to vector<1x8x4xf32>
    "tpu.trace_start"() <{level = 10 : i32, message = "bqd,bkd->bqk"}> : () -> ()
    %cst_8 = arith.constant dense<0.000000e+00> : vector<1x8x8xf32>
    %19 = tpu.matmul %16, %17, %cst_8 {dimension_numbers = #tpu.dot_dimension_numbers<[2], [2], [1], [1], [0, 0, 0, 1, 1, 1], [0], [0]>} : vector<1x8x4xf32>, vector<1x8x4xf32>, vector<1x8x8xf32> -> vector<1x8x8xf32>
    "tpu.trace_stop"() : () -> ()
    %20 = vector.extract_strided_slice %7 {offsets = [0, 0, 12], sizes = [1, 8, 4], strides = [1, 1, 1]} : vector<1x8x96xf32> to vector<1x8x4xf32>
    %21 = vector.extract_strided_slice %7 {offsets = [0, 0, 44], sizes = [1, 8, 4], strides = [1, 1, 1]} : vector<1x8x96xf32> to vector<1x8x4xf32>
    %22 = vector.extract_strided_slice %7 {offsets = [0, 0, 76], sizes = [1, 8, 4], strides = [1, 1, 1]} : vector<1x8x96xf32> to vector<1x8x4xf32>
    "tpu.trace_start"() <{level = 10 : i32, message = "bqd,bkd->bqk"}> : () -> ()
    %cst_9 = arith.constant dense<0.000000e+00> : vector<1x8x8xf32>
    %23 = tpu.matmul %20, %21, %cst_9 {dimension_numbers = #tpu.dot_dimension_numbers<[2], [2], [1], [1], [0, 0, 0, 1, 1, 1], [0], [0]>} : vector<1x8x4xf32>, vector<1x8x4xf32>, vector<1x8x8xf32> -> vector<1x8x8xf32>
    "tpu.trace_stop"() : () -> ()
    %24 = vector.extract_strided_slice %7 {offsets = [0, 0, 16], sizes = [1, 8, 4], strides = [1, 1, 1]} : vector<1x8x96xf32> to vector<1x8x4xf32>
    %25 = vector.extract_strided_slice %7 {offsets = [0, 0, 48], sizes = [1, 8, 4], strides = [1, 1, 1]} : vector<1x8x96xf32> to vector<1x8x4xf32>
    %26 = vector.extract_strided_slice %7 {offsets = [0, 0, 80], sizes = [1, 8, 4], strides = [1, 1, 1]} : vector<1x8x96xf32> to vector<1x8x4xf32>
    "tpu.trace_start"() <{level = 10 : i32, message = "bqd,bkd->bqk"}> : () -> ()
    %cst_10 = arith.constant dense<0.000000e+00> : vector<1x8x8xf32>
    %27 = tpu.matmul %24, %25, %cst_10 {dimension_numbers = #tpu.dot_dimension_numbers<[2], [2], [1], [1], [0, 0, 0, 1, 1, 1], [0], [0]>} : vector<1x8x4xf32>, vector<1x8x4xf32>, vector<1x8x8xf32> -> vector<1x8x8xf32>
    "tpu.trace_stop"() : () -> ()
    %28 = vector.extract_strided_slice %7 {offsets = [0, 0, 20], sizes = [1, 8, 4], strides = [1, 1, 1]} : vector<1x8x96xf32> to vector<1x8x4xf32>
    %29 = vector.extract_strided_slice %7 {offsets = [0, 0, 52], sizes = [1, 8, 4], strides = [1, 1, 1]} : vector<1x8x96xf32> to vector<1x8x4xf32>
    %30 = vector.extract_strided_slice %7 {offsets = [0, 0, 84], sizes = [1, 8, 4], strides = [1, 1, 1]} : vector<1x8x96xf32> to vector<1x8x4xf32>
    "tpu.trace_start"() <{level = 10 : i32, message = "bqd,bkd->bqk"}> : () -> ()
    %cst_11 = arith.constant dense<0.000000e+00> : vector<1x8x8xf32>
    %31 = tpu.matmul %28, %29, %cst_11 {dimension_numbers = #tpu.dot_dimension_numbers<[2], [2], [1], [1], [0, 0, 0, 1, 1, 1], [0], [0]>} : vector<1x8x4xf32>, vector<1x8x4xf32>, vector<1x8x8xf32> -> vector<1x8x8xf32>
    "tpu.trace_stop"() : () -> ()
    %32 = vector.extract_strided_slice %7 {offsets = [0, 0, 24], sizes = [1, 8, 4], strides = [1, 1, 1]} : vector<1x8x96xf32> to vector<1x8x4xf32>
    %33 = vector.extract_strided_slice %7 {offsets = [0, 0, 56], sizes = [1, 8, 4], strides = [1, 1, 1]} : vector<1x8x96xf32> to vector<1x8x4xf32>
    %34 = vector.extract_strided_slice %7 {offsets = [0, 0, 88], sizes = [1, 8, 4], strides = [1, 1, 1]} : vector<1x8x96xf32> to vector<1x8x4xf32>
    "tpu.trace_start"() <{level = 10 : i32, message = "bqd,bkd->bqk"}> : () -> ()
    %cst_12 = arith.constant dense<0.000000e+00> : vector<1x8x8xf32>
    %35 = tpu.matmul %32, %33, %cst_12 {dimension_numbers = #tpu.dot_dimension_numbers<[2], [2], [1], [1], [0, 0, 0, 1, 1, 1], [0], [0]>} : vector<1x8x4xf32>, vector<1x8x4xf32>, vector<1x8x8xf32> -> vector<1x8x8xf32>
    "tpu.trace_stop"() : () -> ()
    %36 = vector.extract_strided_slice %7 {offsets = [0, 0, 28], sizes = [1, 8, 4], strides = [1, 1, 1]} : vector<1x8x96xf32> to vector<1x8x4xf32>
    %37 = vector.extract_strided_slice %7 {offsets = [0, 0, 60], sizes = [1, 8, 4], strides = [1, 1, 1]} : vector<1x8x96xf32> to vector<1x8x4xf32>
    %38 = vector.extract_strided_slice %7 {offsets = [0, 0, 92], sizes = [1, 8, 4], strides = [1, 1, 1]} : vector<1x8x96xf32> to vector<1x8x4xf32>
    "tpu.trace_start"() <{level = 10 : i32, message = "bqd,bkd->bqk"}> : () -> ()
    %cst_13 = arith.constant dense<0.000000e+00> : vector<1x8x8xf32>
    %39 = tpu.matmul %36, %37, %cst_13 {dimension_numbers = #tpu.dot_dimension_numbers<[2], [2], [1], [1], [0, 0, 0, 1, 1, 1], [0], [0]>} : vector<1x8x4xf32>, vector<1x8x4xf32>, vector<1x8x8xf32> -> vector<1x8x8xf32>
    "tpu.trace_stop"() : () -> ()
    %40 = vector.shape_cast %11 : vector<1x8x8xf32> to vector<1x1x8x8xf32>
    %41 = vector.shape_cast %15 : vector<1x8x8xf32> to vector<1x1x8x8xf32>
    %42 = vector.shape_cast %19 : vector<1x8x8xf32> to vector<1x1x8x8xf32>
    %43 = vector.shape_cast %23 : vector<1x8x8xf32> to vector<1x1x8x8xf32>
    %44 = vector.shape_cast %27 : vector<1x8x8xf32> to vector<1x1x8x8xf32>
    %45 = vector.shape_cast %31 : vector<1x8x8xf32> to vector<1x1x8x8xf32>
    %46 = vector.shape_cast %35 : vector<1x8x8xf32> to vector<1x1x8x8xf32>
    %47 = vector.shape_cast %39 : vector<1x8x8xf32> to vector<1x1x8x8xf32>
    %48 = tpu.concatenate %40, %41, %42, %43, %44, %45, %46, %47 in 0 : vector<1x1x8x8xf32>, vector<1x1x8x8xf32>, vector<1x1x8x8xf32>, vector<1x1x8x8xf32>, vector<1x1x8x8xf32>, vector<1x1x8x8xf32>, vector<1x1x8x8xf32>, vector<1x1x8x8xf32> -> vector<8x1x8x8xf32>
    %cst_14 = arith.constant dense<0xFF800000> : vector<8x1x8xf32>
    %49 = vector.multi_reduction <maximumf>, %48, %cst_14 [3] : vector<8x1x8x8xf32> to vector<8x1x8xf32>
    %50 = vector.shape_cast %49 : vector<8x1x8xf32> to vector<8x1x8x1xf32>
    %51 = vector.broadcast %50 : vector<8x1x8x1xf32> to vector<8x1x8x8xf32>
    %52 = arith.subf %48, %51 : vector<8x1x8x8xf32>
    %53 = math.exp %52 : vector<8x1x8x8xf32>
    %cst_15 = arith.constant dense<0.000000e+00> : vector<8x1x8xf32>
    %54 = vector.multi_reduction <add>, %53, %cst_15 [3] : vector<8x1x8x8xf32> to vector<8x1x8xf32>
    %55 = vector.shape_cast %54 : vector<8x1x8xf32> to vector<8x1x8x1xf32>
    %56 = tpu.reciprocal %55 {approx = true} : vector<8x1x8x1xf32> -> vector<8x1x8x1xf32>
    %57 = vector.broadcast %56 : vector<8x1x8x1xf32> to vector<8x1x8x8xf32>
    %58 = arith.mulf %53, %57 : vector<8x1x8x8xf32>
    %59 = vector.extract_strided_slice %58 {offsets = [0, 0, 0, 0], sizes = [1, 1, 8, 8], strides = [1, 1, 1, 1]} : vector<8x1x8x8xf32> to vector<1x1x8x8xf32>
    %60 = vector.shape_cast %59 : vector<1x1x8x8xf32> to vector<1x8x8xf32>
    "tpu.trace_start"() <{level = 10 : i32, message = "bqk,bkd->bqd"}> : () -> ()
    %cst_16 = arith.constant dense<0.000000e+00> : vector<1x8x4xf32>
    %61 = tpu.matmul %60, %10, %cst_16 {dimension_numbers = #tpu.dot_dimension_numbers<[2], [1], [1], [2], [0, 0, 0, 1, 1, 2], [0], [0]>} : vector<1x8x8xf32>, vector<1x8x4xf32>, vector<1x8x4xf32> -> vector<1x8x4xf32>
    "tpu.trace_stop"() : () -> ()
    %62 = vector.extract_strided_slice %58 {offsets = [1, 0, 0, 0], sizes = [1, 1, 8, 8], strides = [1, 1, 1, 1]} : vector<8x1x8x8xf32> to vector<1x1x8x8xf32>
    %63 = vector.shape_cast %62 : vector<1x1x8x8xf32> to vector<1x8x8xf32>
    "tpu.trace_start"() <{level = 10 : i32, message = "bqk,bkd->bqd"}> : () -> ()
    %cst_17 = arith.constant dense<0.000000e+00> : vector<1x8x4xf32>
    %64 = tpu.matmul %63, %14, %cst_17 {dimension_numbers = #tpu.dot_dimension_numbers<[2], [1], [1], [2], [0, 0, 0, 1, 1, 2], [0], [0]>} : vector<1x8x8xf32>, vector<1x8x4xf32>, vector<1x8x4xf32> -> vector<1x8x4xf32>
    "tpu.trace_stop"() : () -> ()
    %65 = vector.extract_strided_slice %58 {offsets = [2, 0, 0, 0], sizes = [1, 1, 8, 8], strides = [1, 1, 1, 1]} : vector<8x1x8x8xf32> to vector<1x1x8x8xf32>
    %66 = vector.shape_cast %65 : vector<1x1x8x8xf32> to vector<1x8x8xf32>
    "tpu.trace_start"() <{level = 10 : i32, message = "bqk,bkd->bqd"}> : () -> ()
    %cst_18 = arith.constant dense<0.000000e+00> : vector<1x8x4xf32>
    %67 = tpu.matmul %66, %18, %cst_18 {dimension_numbers = #tpu.dot_dimension_numbers<[2], [1], [1], [2], [0, 0, 0, 1, 1, 2], [0], [0]>} : vector<1x8x8xf32>, vector<1x8x4xf32>, vector<1x8x4xf32> -> vector<1x8x4xf32>
    "tpu.trace_stop"() : () -> ()
    %68 = vector.extract_strided_slice %58 {offsets = [3, 0, 0, 0], sizes = [1, 1, 8, 8], strides = [1, 1, 1, 1]} : vector<8x1x8x8xf32> to vector<1x1x8x8xf32>
    %69 = vector.shape_cast %68 : vector<1x1x8x8xf32> to vector<1x8x8xf32>
    "tpu.trace_start"() <{level = 10 : i32, message = "bqk,bkd->bqd"}> : () -> ()
    %cst_19 = arith.constant dense<0.000000e+00> : vector<1x8x4xf32>
    %70 = tpu.matmul %69, %22, %cst_19 {dimension_numbers = #tpu.dot_dimension_numbers<[2], [1], [1], [2], [0, 0, 0, 1, 1, 2], [0], [0]>} : vector<1x8x8xf32>, vector<1x8x4xf32>, vector<1x8x4xf32> -> vector<1x8x4xf32>
    "tpu.trace_stop"() : () -> ()
    %71 = vector.extract_strided_slice %58 {offsets = [4, 0, 0, 0], sizes = [1, 1, 8, 8], strides = [1, 1, 1, 1]} : vector<8x1x8x8xf32> to vector<1x1x8x8xf32>
    %72 = vector.shape_cast %71 : vector<1x1x8x8xf32> to vector<1x8x8xf32>
    "tpu.trace_start"() <{level = 10 : i32, message = "bqk,bkd->bqd"}> : () -> ()
    %cst_20 = arith.constant dense<0.000000e+00> : vector<1x8x4xf32>
    %73 = tpu.matmul %72, %26, %cst_20 {dimension_numbers = #tpu.dot_dimension_numbers<[2], [1], [1], [2], [0, 0, 0, 1, 1, 2], [0], [0]>} : vector<1x8x8xf32>, vector<1x8x4xf32>, vector<1x8x4xf32> -> vector<1x8x4xf32>
    "tpu.trace_stop"() : () -> ()
    %74 = vector.extract_strided_slice %58 {offsets = [5, 0, 0, 0], sizes = [1, 1, 8, 8], strides = [1, 1, 1, 1]} : vector<8x1x8x8xf32> to vector<1x1x8x8xf32>
    %75 = vector.shape_cast %74 : vector<1x1x8x8xf32> to vector<1x8x8xf32>
    "tpu.trace_start"() <{level = 10 : i32, message = "bqk,bkd->bqd"}> : () -> ()
    %cst_21 = arith.constant dense<0.000000e+00> : vector<1x8x4xf32>
    %76 = tpu.matmul %75, %30, %cst_21 {dimension_numbers = #tpu.dot_dimension_numbers<[2], [1], [1], [2], [0, 0, 0, 1, 1, 2], [0], [0]>} : vector<1x8x8xf32>, vector<1x8x4xf32>, vector<1x8x4xf32> -> vector<1x8x4xf32>
    "tpu.trace_stop"() : () -> ()
    %77 = vector.extract_strided_slice %58 {offsets = [6, 0, 0, 0], sizes = [1, 1, 8, 8], strides = [1, 1, 1, 1]} : vector<8x1x8x8xf32> to vector<1x1x8x8xf32>
    %78 = vector.shape_cast %77 : vector<1x1x8x8xf32> to vector<1x8x8xf32>
    "tpu.trace_start"() <{level = 10 : i32, message = "bqk,bkd->bqd"}> : () -> ()
    %cst_22 = arith.constant dense<0.000000e+00> : vector<1x8x4xf32>
    %79 = tpu.matmul %78, %34, %cst_22 {dimension_numbers = #tpu.dot_dimension_numbers<[2], [1], [1], [2], [0, 0, 0, 1, 1, 2], [0], [0]>} : vector<1x8x8xf32>, vector<1x8x4xf32>, vector<1x8x4xf32> -> vector<1x8x4xf32>
    "tpu.trace_stop"() : () -> ()
    %80 = vector.extract_strided_slice %58 {offsets = [7, 0, 0, 0], sizes = [1, 1, 8, 8], strides = [1, 1, 1, 1]} : vector<8x1x8x8xf32> to vector<1x1x8x8xf32>
    %81 = vector.shape_cast %80 : vector<1x1x8x8xf32> to vector<1x8x8xf32>
    "tpu.trace_start"() <{level = 10 : i32, message = "bqk,bkd->bqd"}> : () -> ()
    %cst_23 = arith.constant dense<0.000000e+00> : vector<1x8x4xf32>
    %82 = tpu.matmul %81, %38, %cst_23 {dimension_numbers = #tpu.dot_dimension_numbers<[2], [1], [1], [2], [0, 0, 0, 1, 1, 2], [0], [0]>} : vector<1x8x8xf32>, vector<1x8x4xf32>, vector<1x8x4xf32> -> vector<1x8x4xf32>
    "tpu.trace_stop"() : () -> ()
    %83 = tpu.concatenate %61, %64, %67, %70, %73, %76, %79, %82 in 2 : vector<1x8x4xf32>, vector<1x8x4xf32>, vector<1x8x4xf32>, vector<1x8x4xf32>, vector<1x8x4xf32>, vector<1x8x4xf32>, vector<1x8x4xf32>, vector<1x8x4xf32> -> vector<1x8x32xf32>
    %84 = vector.shape_cast %83 : vector<1x8x32xf32> to vector<8x32xf32>
    %c0_24 = arith.constant 0 : index
    %c0_25 = arith.constant 0 : index
    %85 = vector.load %arg3[%c0_24, %c0_25] : memref<32x6xf32, #tpu.memory_space<vmem>>, vector<32x6xf32>
    %cst_26 = arith.constant dense<0.000000e+00> : vector<8x6xf32>
    %86 = tpu.matmul %84, %85, %cst_26 {dimension_numbers = #tpu.dot_dimension_numbers<[1], [0], [0], [1], [0, 0, 1, 1], [], []>} : vector<8x32xf32>, vector<32x6xf32>, vector<8x6xf32> -> vector<8x6xf32>
    %87 = vector.broadcast %1 : vector<1x6xf32> to vector<8x6xf32>
    %88 = arith.addf %86, %87 : vector<8x6xf32>
    %c0_27 = arith.constant 0 : index
    %c0_28 = arith.constant 0 : index
    %89 = vector.load %arg5[%c0_27, %c0_28] : memref<8x6xf32, #tpu.memory_space<vmem>>, vector<8x6xf32>
    tpu.vector_store %arg5[%c0_27, %c0_28], %88 {strides = array<i32>} : memref<8x6xf32, #tpu.memory_space<vmem>>, vector<8x6xf32>,
    return
  }
  func.func @transform_0(%arg0: i32) -> (i32, i32) {
    %c0_i32 = arith.constant 0 : i32
    %c0_i32_0 = arith.constant 0 : i32
    return %arg0, %c0_i32 : i32, i32
  }
  func.func @transform_1(%arg0: i32) -> (i32, i32) {
    %c0_i32 = arith.constant 0 : i32
    %c0_i32_0 = arith.constant 0 : i32
    %c0_i32_1 = arith.constant 0 : i32
    return %c0_i32, %c0_i32_0 : i32, i32
  }
  func.func @transform_2(%arg0: i32) -> (i32, i32) {
    %c0_i32 = arith.constant 0 : i32
    %c0_i32_0 = arith.constant 0 : i32
    %c0_i32_1 = arith.constant 0 : i32
    return %c0_i32, %c0_i32_0 : i32, i32
  }
  func.func @transform_3(%arg0: i32) -> (i32, i32) {
    %c0_i32 = arith.constant 0 : i32
    %c0_i32_0 = arith.constant 0 : i32
    %c0_i32_1 = arith.constant 0 : i32
    return %c0_i32, %c0_i32_0 : i32, i32
  }
  func.func @transform_4(%arg0: i32) -> (i32, i32) {
    %c0_i32 = arith.constant 0 : i32
    %c0_i32_0 = arith.constant 0 : i32
    return %arg0, %c0_i32 : i32, i32
  }
}

</mosaic_0001>

<bundles_post_ra>
// kernel: tpu_custom_call.1
= control target key start
LH: loop header
LB: loop body
LE: loop exit
PB: predicated region body
PF: predicated region fallthrough
CT: control target
= control target key end

     0   :  { %s2070_s15 = smov 0   ;;  %s2251_s0 = inlined_call_operand.vmem [shape: bf16[16,16], index: 0, kind: input, shape index: {}]   ;;  %s2252_s1 = inlined_call_operand.vmem [shape: bf16[16,96], index: 1, kind: input, shape index: {}]   ;;  %s2253_s2 = inlined_call_operand.vmem [shape: f32[32,6], index: 2, kind: input, shape index: {}]   ;;  %s2254_s3 = inlined_call_operand.vmem [shape: f32[2,128], index: 3, kind: input, shape index: {}]   ;;  %s2255_s4 = inlined_call_operand.vmem [shape: f32[16,6], index: 4, kind: output, shape index: {}]  }
   0x1 LB: > { %s1750_s16 = sadd.s32 4294967295, %s2010_s15   ;;  %p1754_p0 = scmp.ge.s32.totalorder %s2010_s15, 1  ;;  %s2010_s15 = sphi %s2070_s15, %s14_s15  }
   0x2   : > { %p161_p1 = scmp.lt.s32.totalorder %s2010_s15, 3 }
   0x4   : > { %p162_p2 = pnand %p1754_p0, %p161_p1 }
   0x5   : > { %v1971_v0 = vld [vmem:[%s2252_s1] sm:$0xff] (!%p162_p2)   ;;  %v2012_v1 = vmov (!%p162_p2), 0.0   ;;  %p185_p3 = scmp.lt.s32.totalorder (!%p162_p2), %s1750_s16, 1  ;;  %vm2013_vm0 = vmmov (!%p162_p2), 0   ;;  %vm209_vm1 = vcmask (!%p162_p2), 130048   ;;  %s2014_s25 = smov (!%p162_p2), 124  }
   0x6   : > { %165 = sbr.rel (%p162_p2) target bundleno = 1453 (0x5ad), region = 36  ;;  %1827 = vmatprep.subr.bf16.mxu0 (!%p162_p2), %v2012_v1  ;;  %1833 = vmatprep.subr.mxu1 (!%p162_p2), %v2012_v1  ;;  %v1757_v3 = vld [vmem:[%s2254_s3] ss:$0 sm:$0xff] (!%p162_p2)  ;;  %s2015_s26 = smov (!%p162_p2), 96   ;;  %vm256_vm2 = vcmask (!%p162_p2), 31744   ;;  %vm877_vm3 = vcmask (!%p162_p2), 64512  }
   0x7   : > { %1828 = vmatpush3.bf16.msra.mxu0 (!%p162_p2), %v1971_v0  ;;  %1829 = vmatprep.mubr.msk.bf16.mxu0 (!%p162_p2), %vm2013_vm0, %v2012_v1  ;;  %s2016_s27 = smov (!%p162_p2), 88   ;;  %s2017_s28 = smov (!%p162_p2), 92   ;;  %vm1604_vm4 = vcmask (!%p162_p2), 97280   ;;  %vm1607_vm5 = vcmask (!%p162_p2), 162816   ;;  %vm1609_vm6 = vcmask (!%p162_p2), 195584   ;;  %vm1611_vm7 = vcmask (!%p162_p2), 228352  }
   0x8   : > { %1835 = vmatprep.mubr.msk.f32.mxu1 (!%p162_p2), %vm2013_vm0, %v2012_v1  ;;  %1853 = vmatprep.subr.mxu0 (!%p162_p2), %v2012_v1  ;;  %s2018_s29 = smov (!%p162_p2), 84   ;;  %s2019_s30 = smov (!%p162_p2), 120   ;;  %vm1621_vm8 = vcmask (!%p162_p2), 261120   ;;  %vm1695_vm9 = vcmask (!%p162_p2), 48128  }
   0x9   : > { %s2020_s5 = smov (!%p162_p2), 80   ;;  %s2021_s6 = smov (!%p162_p2), 116  }
   0xa   : > { %s2022_s7 = smov (!%p162_p2), 112   ;;  %s2023_s8 = smov (!%p162_p2), 76  }
   0xb   : > { %s2024_s9 = smov (!%p162_p2), 72   ;;  %s2025_s10 = smov (!%p162_p2), 108  }
   0xc   : > { %s2026_s11 = smov (!%p162_p2), 104   ;;  %s2027_s12 = smov (!%p162_p2), 68  }
   0xd   : > { %s2257_s16 = smov (!%p185_p3, %s1750_s16), 1  ;;  %s2028_s13 = smov 100  }
   0xe   : > { %s1755_s19 = sshll.u32 %s2257_s16, 2  ;;  %s2029_s14 = smov 60  }
   0xf   : > { %s188_s22 = scalar_lea.vmem %s2251_s0, %s1755_s19  ;;  %s2030_s17 = smov 64  }
  0x10   : > { %v196_v2 = vld [vmem:[%s188_s22] sm:$0xf]  ;;  %s2031_s18 = smov 56   ;;  %s2032_s19 = smov 52  }
  0x11   : > { %1830 = vmatmul.mubr.msk.bf16.vlgmr.msra.gmra.mrb[0].mxu0 %vm209_vm1, %v196_v2  ;;  %s2033_s20 = smov 48   ;;  %s2034_s21 = smov 40  }
  0x12   : > { %1855 = vmatprep.mubr.msk.f32.mxu0 %vm2013_vm0, %v2012_v1  ;;  %s2035_s22 = smov 44   ;;  %s2036_s23 = smov 36  }
  0x13   : > { %s2037_s24 = smov 4  }
  0xe4   : > { %v247_v4 = vpop.f32.mrb[0].mxu0 }
  0xe5   : > { %v2100_v5 = vadd.f32 %v1757_v3, %v247_v4  ;;  %v1831_v6 = vpop.f32.mrb[1].mxu0 }
  0xe6   : > { %v250_v7 = vpop.f32.mrb[2].mxu0 }
  0xe7   : > { %331 = vrot.lane.b32.xlu1 %v2100_v5, %s2014_s25  ;;  %254 = vrot.lane.b32.xlu0 %v2100_v5, %s2015_s26  ;;  %v1832_v8 = vpop.f32.mrb[3].mxu0  ;;  %s2038_s25 = smov 12  }
  0xeb   : > { %411 = vrot.lane.b32.xlu1 %v2100_v5, %s2016_s27  ;;  %333 = vrot.lane.b32.xlu0 %v2100_v5, %s2017_s28 }
  0xef   : > { %489 = vrot.lane.b32.xlu1 %v2100_v5, %s2018_s29  ;;  %409 = vrot.lane.b32.xlu0 %v2100_v5, %s2019_s30  ;;  %s2040_s30 = smov 20  }
  0xf3   : > { %567 = vrot.lane.b32.xlu1 %v2100_v5, %s2020_s5  ;;  %487 = vrot.lane.b32.xlu0 %v2100_v5, %s2021_s6 }
  0xf7   : > { %565 = vrot.lane.b32.xlu1 %v2100_v5, %s2022_s7  ;;  %645 = vrot.lane.b32.xlu0 %v2100_v5, %s2023_s8 }
  0xfb   : > { %723 = vrot.lane.b32.xlu1 %v2100_v5, %s2024_s9  ;;  %643 = vrot.lane.b32.xlu0 %v2100_v5, %s2025_s10  ;;  %s2041_s9 = smov 28   ;;  %s2042_s10 = smov 8  }
  0xff   : > { %721 = vrot.lane.b32.xlu1 %v2100_v5, %s2026_s11  ;;  %801 = vrot.lane.b32.xlu0 %v2100_v5, %s2027_s12  ;;  %s2043_s11 = smov 16   ;;  %s2044_s12 = smov 24  }
 0x103   : > { %799 = vrot.lane.b32.xlu0 %v2100_v5, %s2028_s13  ;;  %s1756_s13 = sshll.u32 %s2257_s16, 3 }
 0x159   : > { %v332_v9 = vpop.permute.xlu1 %331  ;;  %v255_v10 = vpop.permute.xlu0 %254 }
 0x15a   : > { %1834 = vmatpush3.xpose.msk.msra.mxu1 %vm256_vm2, %v255_v10 }
 0x15b   : > { %1838 = vmatprep.subr.mxu1 %v2012_v1 }
 0x15d   : > { %v412_v11 = vpop.permute.xlu1 %411  ;;  %1836 = vmatmul.mubr.msk.f32.vlgmr.msra.gmra.mrb[0].mxu1 %vm256_vm2, %v2100_v5  ;;  %v334_v12 = vpop.permute.xlu0 %333 }
 0x15e   : > { %1839 = vmatpush3.xpose.msk.msra.mxu1 %vm256_vm2, %v334_v12  ;;  %1840 = vmatprep.mubr.msk.f32.mxu1 %vm2013_vm0, %v2012_v1 }
 0x15f   : > { %1843 = vmatprep.subr.mxu1 %v2012_v1 }
 0x161   : > { %v490_v13 = vpop.permute.xlu1 %489  ;;  %1841 = vmatmul.mubr.msk.f32.vlgmr.msra.gmra.mrb[2].mxu1 %vm256_vm2, %v332_v9  ;;  %v410_v14 = vpop.permute.xlu0 %409 }
 0x162   : > { %1844 = vmatpush3.xpose.msk.msra.mxu1 %vm256_vm2, %v412_v11  ;;  %1845 = vmatprep.mubr.msk.f32.mxu1 %vm2013_vm0, %v2012_v1 }
 0x163   : > { %1848 = vmatprep.subr.mxu1 %v2012_v1 }
 0x165   : > { %v568_v15 = vpop.permute.xlu1 %567  ;;  %1846 = vmatmul.mubr.msk.f32.vlgmr.msra.gmra.mrb[4].mxu1 %vm256_vm2, %v410_v14  ;;  %v488_v16 = vpop.permute.xlu0 %487 }
 0x166   : > { %1849 = vmatpush3.xpose.msk.msra.mxu1 %vm256_vm2, %v490_v13  ;;  %1854 = vmatpush3.xpose.msk.msra.mxu0 %vm256_vm2, %v568_v15 }
 0x167   : > { %1850 = vmatprep.mubr.msk.f32.mxu1 %vm2013_vm0, %v2012_v1  ;;  %1858 = vmatprep.subr.mxu1 %v2012_v1 }
 0x168   : > { %1863 = vmatprep.subr.mxu0 %v2012_v1 }
 0x169   : > { %v566_v17 = vpop.permute.xlu1 %565  ;;  %1851 = vmatmul.mubr.msk.f32.vlgmr.msra.gmra.mrb[6].mxu1 %vm256_vm2, %v488_v16  ;;  %v646_v18 = vpop.permute.xlu0 %645 }
 0x16a   : > { %1856 = vmatmul.mubr.msk.f32.vlgmr.msra.gmra.mrb[4].mxu0 %vm256_vm2, %v566_v17  ;;  %1859 = vmatpush3.xpose.msk.msra.mxu1 %vm256_vm2, %v646_v18 }
 0x16b   : > { %1860 = vmatprep.mubr.msk.f32.mxu1 %vm2013_vm0, %v2012_v1  ;;  %1865 = vmatprep.mubr.msk.f32.mxu0 %vm2013_vm0, %v2012_v1 }
 0x16c   : > { %1868 = vmatprep.subr.mxu1 %v2012_v1 }
 0x16d   : > { %v724_v19 = vpop.permute.xlu1 %723  ;;  %v644_v20 = vpop.permute.xlu0 %643 }
 0x16e   : > { %1861 = vmatmul.mubr.msk.f32.vlgmr.msra.gmra.mrb[8].mxu1 %vm256_vm2, %v644_v20  ;;  %1864 = vmatpush3.xpose.msk.msra.mxu0 %vm256_vm2, %v724_v19 }
 0x16f   : > { %1870 = vmatprep.mubr.msk.f32.mxu1 %vm2013_vm0, %v2012_v1  ;;  %1873 = vmatprep.subr.mxu0 %v2012_v1 }
 0x171   : > { %v722_v21 = vpop.permute.xlu1 %721  ;;  %v802_v22 = vpop.permute.xlu0 %801 }
 0x172   : > { %1866 = vmatmul.mubr.msk.f32.vlgmr.msra.gmra.mrb[6].mxu0 %vm256_vm2, %v722_v21  ;;  %1869 = vmatpush3.xpose.msk.msra.mxu1 %vm256_vm2, %v802_v22 }
 0x173   : > { %1878 = vmatprep.subr.mxu1 %v2012_v1  ;;  %1875 = vmatprep.mubr.msk.f32.mxu0 %vm2013_vm0, %v2012_v1 }
 0x175   : > { %v800_v23 = vpop.permute.xlu0 %799 }
 0x176   : > { %1871 = vmatmul.mubr.msk.f32.vlgmr.msra.gmra.mrb[10].mxu1 %vm256_vm2, %v800_v23 }
 0x177   : > { %1880 = vmatprep.mubr.msk.f32.mxu1 %vm2013_vm0, %v2012_v1 }
 0x230   : > { %v327_v24 = vpop.f32.mrb[0].mxu1 }
 0x231   : > { %v1837_v25 = vpop.f32.mrb[1].mxu1  ;;  %v878_v26 = vsel %vm877_vm3, %v327_v24, -inf }
 0x232   : > { %879 = vmax.xlane.f32.xlu1 %v878_v26 }
 0x234   : > { %v405_v27 = vpop.f32.mrb[2].mxu1 }
 0x235   : > { %v1842_v28 = vpop.f32.mrb[3].mxu1  ;;  %v881_v29 = vsel %vm877_vm3, %v405_v27, -inf }
 0x236   : > { %882 = vmax.xlane.f32.xlu0 %v881_v29 }
 0x238   : > { %v2160_v30 = vpop.f32.mrb[4].mxu1 }
 0x239   : > { %v1847_v31 = vpop.f32.mrb[5].mxu1  ;;  %v884_v32 = vsel %vm877_vm3, %v2160_v30, -inf }
 0x23a   : > { %885 = vmax.xlane.f32.xlu0 %v884_v32 }
 0x23c   : > { %v561_v33 = vpop.f32.mrb[6].mxu1 }
 0x23d   : > { %v1852_v34 = vpop.f32.mrb[7].mxu1  ;;  %v639_v35 = vpop.f32.mrb[4].mxu0  ;;  %v887_v36 = vsel %vm877_vm3, %v561_v33, -inf }
 0x23e   : > { %888 = vmax.xlane.f32.xlu1 %v887_v36  ;;  %v1857_v37 = vpop.f32.mrb[5].mxu0  ;;  %v890_v38 = vsel %vm877_vm3, %v639_v35, -inf }
 0x23f   : > { %891 = vmax.xlane.f32.xlu0 %v890_v38 }
 0x241   : > { %v717_v39 = vpop.f32.mrb[8].mxu1 }
 0x242   : > { %v1862_v40 = vpop.f32.mrb[9].mxu1  ;;  %v893_v41 = vsel %vm877_vm3, %v717_v39, -inf }
 0x243   : > { %894 = vmax.xlane.f32.xlu1 %v893_v41 }
 0x245   : > { %v795_v42 = vpop.f32.mrb[6].mxu0 }
 0x246   : > { %v1867_v43 = vpop.f32.mrb[7].mxu0  ;;  %v896_v44 = vsel %vm877_vm3, %v795_v42, -inf }
 0x247   : > { %897 = vmax.xlane.f32.xlu0 %v896_v44 }
 0x249   : > { %v873_v45 = vpop.f32.mrb[10].mxu1 }
 0x24a   : > { %v1872_v46 = vpop.f32.mrb[11].mxu1  ;;  %v899_v47 = vsel %vm877_vm3, %v873_v45, -inf }
 0x24b   : > { %900 = vmax.xlane.f32.xlu1 %v899_v47 }
 0x25c   : > { %1042 = vrot.lane.b32.xlu1 %v2100_v5, %s2029_s14 }
 0x25d   : > { %966 = vrot.lane.b32.xlu0 %v2100_v5, %s2030_s17 }
 0x260   : > { %1118 = vrot.lane.b32.xlu1 %v2100_v5, %s2031_s18 }
 0x261   : > { %1194 = vrot.lane.b32.xlu0 %v2100_v5, %s2032_s19 }
 0x264   : > { %1270 = vrot.lane.b32.xlu1 %v2100_v5, %s2033_s20  ;;  %s192_s20 = scalar_lea.vmem %s2255_s4, %s1756_s13 }
 0x2bf   : > { %v880_v48 = vpop.xlane.xlu1 %879 }
 0x2c0   : > { %v902_v49 = vsub.f32 %v327_v24, %v880_v48 }
 0x2c2   : > { %v910_v50 = vmul.f32 1.442695, %v902_v49 }
 0x2c3   : > { %v883_v51 = vpop.xlane.xlu0 %882 }
 0x2c4   : > { %1972 = vpow2.f32 %v910_v50  ;;  %v903_v52 = vsub.f32 %v405_v27, %v883_v51 }
 0x2c6   : > { %v912_v53 = vmul.f32 1.442695, %v903_v52 }
 0x2c7   : > { %v886_v54 = vpop.xlane.xlu0 %885 }
 0x2c8   : > { %1974 = vpow2.f32 %v912_v53  ;;  %v904_v3 = vsub.f32 %v2160_v30, %v886_v54 }
 0x2ca   : > { %v914_v9 = vmul.f32 1.442695, %v904_v3 }
 0x2cb   : > { %v889_v55 = vpop.xlane.xlu1 %888 }
 0x2cc   : > { %v905_v56 = vsub.f32 %v561_v33, %v889_v55  ;;  %v892_v57 = vpop.xlane.xlu0 %891 }
 0x2cd   : > { %v906_v58 = vsub.f32 %v639_v35, %v892_v57 }
 0x2ce   : > { %v2174_v59 = vpop.eup %1972  ;;  %v916_v60 = vmul.f32 1.442695, %v905_v56 }
 0x2cf   : > { %v918_v61 = vmul.f32 1.442695, %v906_v58  ;;  %v926_v62 = vsel %vm877_vm3, %v2174_v59, 0.0 }
 0x2d0   : > { %1976 = vpow2.f32 %v916_v60  ;;  %v895_v63 = vpop.xlane.xlu1 %894  ;;  %927 = vadd.xlane.f32.xlu0 %v926_v62 }
 0x2d1   : > { %1978 = vpow2.f32 %v918_v61  ;;  %v907_v0 = vsub.f32 %v717_v39, %v895_v63  ;;  %v1613_v63 = vld [vmem:[%s2253_s2] sm:$0xff] }
 0x2d2   : > { %v1975_v2 = vpop.eup %1974 }
 0x2d3   : > { %v920_v4 = vmul.f32 1.442695, %v907_v0  ;;  %v929_v6 = vsel %vm877_vm3, %v1975_v2, 0.0  ;;  %v1614_v0 = vld [vmem:[%s2253_s2 + $0x8] sm:$0xff] }
 0x2d4   : > { %930 = vadd.xlane.f32.xlu1 %v929_v6  ;;  %v898_v7 = vpop.xlane.xlu0 %897  ;;  %v1615_v6 = vld [vmem:[%s2253_s2 + $0x10] sm:$0xff] }
 0x2d5   : > { %1980 = vpow2.f32 %v920_v4  ;;  %v908_v8 = vsub.f32 %v795_v42, %v898_v7  ;;  %v1616_v7 = vld [vmem:[%s2253_s2 + $0x18] sm:$0xff] }
 0x2d7   : > { %v922_v10 = vmul.f32 1.442695, %v908_v8  ;;  %v1928_v8 = vpack.c.bf16 %v1616_v7, %v1615_v6 }
 0x2d8   : > { %v901_v11 = vpop.xlane.xlu1 %900  ;;  %v967_v12 = vpop.permute.xlu0 %966 }
 0x2d9   : > { %1982 = vpow2.f32 %v922_v10  ;;  %v909_v13 = vsub.f32 %v873_v45, %v901_v11  ;;  %1874 = vmatpush3.msra.mxu0 %v967_v12 }
 0x2da   : > { %v1977_v14 = vpop.eup %1976  ;;  %1883 = vmatprep.subr.mxu0 %v2012_v1  ;;  %1984 = vpow2.f32 %v914_v9 }
 0x2db   : > { %v2181_v15 = vpop.eup %1978  ;;  %v924_v16 = vmul.f32 1.442695, %v909_v13  ;;  %v935_v17 = vsel %vm877_vm3, %v1977_v14, 0.0 }
 0x2dc   : > { %v1043_v18 = vpop.permute.xlu1 %1042  ;;  %936 = vadd.xlane.f32.xlu1 %v935_v17  ;;  %v938_v19 = vsel %vm877_vm3, %v2181_v15, 0.0  ;;  %v1195_v29 = vpop.permute.xlu0 %1194 }
 0x2dd   : > { %1986 = vpow2.f32 %v924_v16  ;;  %1879 = vmatpush3.msra.mxu1 %v1043_v18  ;;  %939 = vadd.xlane.f32.xlu0 %v938_v19 }
 0x2de   : > { %1888 = vmatprep.subr.mxu1 %v2012_v1 }
 0x2df   : > { %v1981_v20 = vpop.eup %1980 }
 0x2e0   : > { %v941_v21 = vsel %vm877_vm3, %v1981_v20, 0.0  ;;  %v1119_v28 = vpop.permute.xlu1 %1118 }
 0x2e1   : > { %942 = vadd.xlane.f32.xlu1 %v941_v21 }
 0x2e3   : > { %v2188_v22 = vpop.eup %1982 }
 0x2e4   : > { %v944_v23 = vsel %vm877_vm3, %v2188_v22, 0.0  ;;  %v1985_v24 = vpop.eup %1984  ;;  %v1271_v30 = vpop.permute.xlu1 %1270 }
 0x2e5   : > { %945 = vadd.xlane.f32.xlu0 %v944_v23  ;;  %v932_v27 = vsel %vm877_vm3, %v1985_v24, 0.0 }
 0x2e7   : > { %v1987_v25 = vpop.eup %1986 }
 0x2e8   : > { %v947_v26 = vsel %vm877_vm3, %v1987_v25, 0.0 }
 0x2e9   : > { %948 = vadd.xlane.f32.xlu1 %v947_v26  ;;  %933 = vadd.xlane.f32.xlu0 %v932_v27 }
 0x2fa   : > { %1422 = vrot.lane.b32.xlu1 %v2100_v5, %s2034_s21 }
 0x2ff   : > { %1346 = vrot.lane.b32.xlu0 %v2100_v5, %s2035_s22 }
 0x303   : > { %1498 = vrot.lane.b32.xlu0 %v2100_v5, %s2036_s23 }
 0x35d   : > { %v928_v31 = vpop.xlane.xlu0 %927 }
 0x35e   : > { %1988 = vrcp.f32 %v928_v31  ;;  %v1784_v31 = vld [vmem:[%s2254_s3 + $0x1] ss:$0 sm:$0xff] }
 0x361   : > { %v931_v32 = vpop.xlane.xlu1 %930 }
 0x362   : > { %1990 = vrcp.f32 %v931_v32 }
 0x368   : > { %v1989_v33 = vpop.eup %1988 }
 0x369   : > { %v958_v34 = vmul.f32 %v1989_v33, %v2174_v59  ;;  %v937_v35 = vpop.xlane.xlu1 %936 }
 0x36a   : > { %1992 = vrcp.f32 %v937_v35  ;;  %v940_v37 = vpop.xlane.xlu0 %939 }
 0x36b   : > { %1876 = vmatmul.mubr.msk.f32.vlgmr.msra.gmra.mrb[8].mxu0 %vm877_vm3, %v958_v34 }
 0x36c   : > { %v1991_v36 = vpop.eup %1990  ;;  %1884 = vmatpush3.msra.mxu0 %v1119_v28  ;;  %1885 = vmatprep.mubr.msk.f32.mxu0 %vm2013_vm0, %v2012_v1 }
 0x36d   : > { %v959_v5 = vmul.f32 %v1991_v36, %v1975_v2  ;;  %1893 = vmatprep.subr.mxu0 %v2012_v1  ;;  %v2039_v2 = vmov 0.0|0.0  }
 0x36e   : > { %v943_v38 = vpop.xlane.xlu1 %942 }
 0x36f   : > { %1994 = vrcp.f32 %v943_v38  ;;  %1881 = vmatmul.mubr.msk.f32.vlgmr.msra.gmra.mrb[12].mxu1 %vm877_vm3, %v959_v5 }
 0x370   : > { %1889 = vmatpush3.msra.mxu1 %v1195_v29  ;;  %1890 = vmatprep.mubr.msk.f32.mxu1 %vm2013_vm0, %v2012_v1 }
 0x371   : > { %1898 = vmatprep.subr.mxu1 %v2012_v1 }
 0x372   : > { %v946_v39 = vpop.xlane.xlu0 %945 }
 0x374   : > { %v1993_v40 = vpop.eup %1992 }
 0x375   : > { %v961_v41 = vmul.f32 %v1993_v40, %v1977_v14 }
 0x376   : > { %v949_v42 = vpop.xlane.xlu1 %948  ;;  %v934_v43 = vpop.xlane.xlu0 %933 }
 0x377   : > { %1996 = vrcp.f32 %v949_v42  ;;  %1891 = vmatmul.mubr.msk.f32.vlgmr.msra.gmra.mrb[14].mxu1 %vm877_vm3, %v961_v41 }
 0x378   : > { %1998 = vrcp.f32 %v934_v43  ;;  %1900 = vmatprep.mubr.msk.f32.mxu1 %vm2013_vm0, %v2012_v1 }
 0x379   : > { %v1995_v44 = vpop.eup %1994  ;;  %2000 = vrcp.f32 %v940_v37 }
 0x37a   : > { %v963_v45 = vmul.f32 %v1995_v44, %v1981_v20  ;;  %v1347_v46 = vpop.permute.xlu0 %1346  ;;  %2002 = vrcp.f32 %v946_v39  ;;  %v1423_v55 = vpop.permute.xlu1 %1422 }
 0x37b   : > { %1899 = vmatpush3.msra.mxu1 %v1347_v46 }
 0x37c   : > { %1901 = vmatmul.mubr.msk.f32.vlgmr.msra.gmra.mrb[16].mxu1 %vm877_vm3, %v963_v45  ;;  %1908 = vmatprep.subr.mxu1 %v2012_v1 }
 0x37d   : > { %1910 = vmatprep.mubr.msk.f32.mxu1 %vm2013_vm0, %v2012_v1 }
 0x37e   : > { %v1499_v47 = vpop.permute.xlu0 %1498 }
 0x37f   : > { %1909 = vmatpush3.msra.mxu1 %v1499_v47 }
 0x381   : > { %v1997_v48 = vpop.eup %1996 }
 0x382   : > { %v1999_v49 = vpop.eup %1998  ;;  %v965_v50 = vmul.f32 %v1997_v48, %v1987_v25 }
 0x383   : > { %v960_v51 = vmul.f32 %v1999_v49, %v1985_v24  ;;  %v2001_v52 = vpop.eup %2000 }
 0x384   : > { %1911 = vmatmul.mubr.msk.f32.vlgmr.msra.gmra.mrb[18].mxu1 %vm877_vm3, %v965_v50  ;;  %v962_v53 = vmul.f32 %v2001_v52, %v2181_v15  ;;  %v2003_v54 = vpop.eup %2002 }
 0x385   : > { %1886 = vmatmul.mubr.msk.f32.vlgmr.msra.gmra.mrb[10].mxu0 %vm877_vm3, %v960_v51  ;;  %v964_v56 = vmul.f32 %v2003_v54, %v2188_v22 }
 0x386   : > { %1894 = vmatpush3.msra.mxu0 %v1271_v30  ;;  %1895 = vmatprep.mubr.msk.f32.mxu0 %vm2013_vm0, %v2012_v1 }
 0x387   : > { %1903 = vmatprep.subr.mxu0 %v2012_v1 }
 0x389   : > { %1896 = vmatmul.mubr.msk.f32.vlgmr.msra.gmra.mrb[12].mxu0 %vm877_vm3, %v962_v53 }
 0x38a   : > { %1904 = vmatpush3.msra.mxu0 %v1423_v55  ;;  %1905 = vmatprep.mubr.msk.f32.mxu0 %vm2013_vm0, %v2012_v1 }
 0x38b   : > { %1924 = vmatprep.subr.bf16.mxu0 %v2039_v2 }
 0x38d   : > { %1906 = vmatmul.mubr.msk.f32.vlgmr.msra.gmra.mrb[14].mxu0 %vm877_vm3, %v964_v56 }
 0x38e   : > { %1921 = vmatprep.mubr.msk.f32.mxu0 %vm2013_vm0, %v2012_v1  ;;  %v1925_v1 = vpack.c.bf16 %v1614_v0, %v1613_v63 }
 0x390   : > { %1926 = vmatpush3.bf16.msra.mxu0 %v1925_v1 }
 0x391   : > { %1927 = vmatprep.subr.bf16.mxu0 %v2039_v2 }
 0x394   : > { %1929 = vmatpush3.bf16.msra.mxu0 %v1928_v8 }
 0x43e   : > { %v1038_v57 = vpop.f32.mrb[8].mxu0 }
 0x43f   : > { %v1877_v58 = vpop.f32.mrb[9].mxu0 }
 0x442   : > { %v1114_v59 = vpop.f32.mrb[12].mxu1 }
 0x443   : > { %1575 = vrot.lane.b32.xlu1 %v1114_v59, %s2037_s24  ;;  %v1882_v60 = vpop.f32.mrb[13].mxu1 }
 0x44a   : > { %v1266_v61 = vpop.f32.mrb[14].mxu1 }
 0x44b   : > { %1583 = vrot.lane.b32.xlu1 %v1266_v61, %s2038_s25  ;;  %v1892_v62 = vpop.f32.mrb[15].mxu1 }
 0x44f   : > { %v1418_v3 = vpop.f32.mrb[16].mxu1 }
 0x450   : > { %1591 = vrot.lane.b32.xlu1 %v1418_v3, %s2040_s30  ;;  %v1902_v4 = vpop.f32.mrb[17].mxu1 }
 0x457   : > { %v1570_v9 = vpop.f32.mrb[18].mxu1 }
 0x458   : > { %v1190_v10 = vpop.f32.mrb[10].mxu0  ;;  %1599 = vrot.lane.b32.xlu1 %v1570_v9, %s2041_s9  ;;  %v1912_v11 = vpop.f32.mrb[19].mxu1 }
 0x459   : > { %1579 = vrot.lane.b32.xlu0 %v1190_v10, %s2042_s10  ;;  %v1887_v12 = vpop.f32.mrb[11].mxu0 }
 0x45c   : > { %v1342_v13 = vpop.f32.mrb[12].mxu0 }
 0x45d   : > { %1587 = vrot.lane.b32.xlu0 %v1342_v13, %s2043_s11  ;;  %v1897_v14 = vpop.f32.mrb[13].mxu0 }
 0x460   : > { %v1494_v15 = vpop.f32.mrb[14].mxu0 }
 0x461   : > { %1595 = vrot.lane.b32.xlu0 %v1494_v15, %s2044_s12  ;;  %v1907_v16 = vpop.f32.mrb[15].mxu0 }
 0x4b5   : > { %v1576_v17 = vpop.permute.xlu1 %1575 }
 0x4b6   : > { %v1602_v19 = vsel %vm256_vm2, %v1038_v57, %v1576_v17 }
 0x4bd   : > { %v1584_v18 = vpop.permute.xlu1 %1583 }
 0x4c2   : > { %v1592_v24 = vpop.permute.xlu1 %1591 }
 0x4ca   : > { %v1600_v28 = vpop.permute.xlu1 %1599 }
 0x4cb   : > { %v1580_v20 = vpop.permute.xlu0 %1579 }
 0x4cc   : > { %v1603_v21 = vsel %vm877_vm3, %v1602_v19, %v1580_v20 }
 0x4cd   : > { %v1605_v22 = vsel %vm1604_vm4, %v1603_v21, %v1584_v18 }
 0x4cf   : > { %v1588_v23 = vpop.permute.xlu0 %1587 }
 0x4d0   : > { %v1606_v25 = vsel %vm209_vm1, %v1605_v22, %v1588_v23 }
 0x4d1   : > { %v1608_v26 = vsel %vm1607_vm5, %v1606_v25, %v1592_v24 }
 0x4d3   : > { %v1596_v27 = vpop.permute.xlu0 %1595 }
 0x4d4   : > { %v1610_v29 = vsel %vm1609_vm6, %v1608_v26, %v1596_v27 }
 0x4d5   : > { %v1612_v30 = vsel %vm1611_vm7, %v1610_v29, %v1600_v28 }
 0x4d6   : > { %1922 = vmatmul.mubr.msk.f32.vlgmr.msra.gmra.mrb[16].mxu0 %vm1621_vm8, %v1612_v30 }
 0x5a9   : > { %v1691_v32 = vpop.f32.mrb[16].mxu0 }
 0x5aa   : > { %v1692_v33 = vadd.f32 %v1784_v31, %v1691_v32  ;;  %v1923_v34 = vpop.f32.mrb[17].mxu0 }
 0x5ac   : > { %1696 = vst.msk [vmem:[%s192_s20] sm:$0xff] %vm1695_vm9, %v1692_v33 }
 0x5ad PF: > { %s14_s15 = sadd.s32 1, %s2010_s15  }
 0x5ae   : > { %p11_p4 = scmp.ge.s32.totalorder %s14_s15, 4  }
 0x5b0   :  { %13 = sbr.rel (!%p11_p4) target bundleno = 1 (0x1), region = 66 }

</bundles_post_ra>
